<compile_context>
chip_gen: v6e
topology: v6e:2x2x1
jax: 0.10.0
libtpu: 0.0.40
codegen_flags: <defaults>
</compile_context>

<pallas_src>
import functools

import jax
import jax.numpy as jnp
from jax import lax
from jax.experimental import pallas as pl
from jax.experimental.pallas import tpu as pltpu


def _inter_attention_kernel(d1_ref, d2_ref, g_ref, b_ref,
                            wq_ref, wkv_ref, wo_ref, hlm_ref, bias_ref,
                            o_ref, *, bb, n_tok, m_tok, heads, dim_head, eps):
    """One block of `bb` batch rows per grid step (5 MXU pushes total)."""
    inner = heads * dim_head
    nq = bb * n_tok                       # query rows in this step
    nk = bb * m_tok                       # key/value rows in this step

    d1 = d1_ref[...].astype(jnp.float32)            # (nq, D)
    d2 = d2_ref[...].astype(jnp.float32)            # (nk, D)
    gamma = g_ref[...].astype(jnp.float32)          # (1, D)
    beta = b_ref[...].astype(jnp.float32)           # (1, D)

    # ---- merged LayerNorm: one mean/var/rsqrt chain for query + context rows ----
    x = jnp.concatenate([d1, d2], axis=0)           # (nq + nk, D)
    mu = jnp.mean(x, axis=-1, keepdims=True)
    xc = x - mu
    var = jnp.mean(xc * xc, axis=-1, keepdims=True)
    xn = xc * lax.rsqrt(var + eps) * gamma + beta
    d1n = xn[:nq].astype(jnp.bfloat16)              # (nq, D)  bf16 only at MXU boundary
    d2n = xn[nq:].astype(jnp.bfloat16)              # (nk, D)

    # ---- fused projections: 2 MXU pushes (softmax scale pre-folded into Wq) -----
    q = jnp.dot(d1n, wq_ref[...], preferred_element_type=jnp.float32)    # (nq, inner)
    kv = jnp.dot(d2n, wkv_ref[...], preferred_element_type=jnp.float32)  # (nk, 2*inner)
    k = kv[:, :inner]                                                    # (nk, inner)
    v = kv[:, inner:]                                                    # (nk, inner)

    # ---- head stacking without reshapes/transposes ------------------------------
    # Tile q/k/v `heads` times along sublanes.  The precomputed lane mask zeroes,
    # for row-block h of the tiled K/V, every lane outside head-h's dim_head block:
    #   S[(h,n), (h',m)] = q[n] . k_masked[(h',m)] = q_{h'}[n] . k_{h'}[m]
    # so the same-head blocks we keep are the exact per-head scores, and P @ V_masked
    # scatters each head's output into its own disjoint lane block.
    hlm = hlm_ref[...]                                                   # (heads*nk, inner)
    q_stk = jnp.concatenate([q] * heads, axis=0).astype(jnp.bfloat16)    # (heads*nq, inner)
    k_stk = (jnp.concatenate([k] * heads, axis=0) * hlm).astype(jnp.bfloat16)
    v_stk = (jnp.concatenate([v] * heads, axis=0) * hlm).astype(jnp.bfloat16)

    # ---- one score matmul + one softmax chain for every (batch-row, head) -------
    s = lax.dot_general(q_stk, k_stk, (((1,), (1,)), ((), ())),
                        preferred_element_type=jnp.float32)              # (heads*nq, heads*nk)
    s = s + bias_ref[...]                            # 0 on same-(head,batch) blocks, -1e30 off
    s = s - jnp.max(s, axis=-1, keepdims=True)
    p = jnp.exp(s)                                   # masked entries underflow to exact 0
    inv_l = pl.reciprocal(jnp.sum(p, axis=-1, keepdims=True), approx=True)

    # ---- one P @ V matmul; per-head outputs land in disjoint lane blocks --------
    o_stk = jnp.dot(p.astype(jnp.bfloat16), v_stk,
                    preferred_element_type=jnp.float32)                  # (heads*nq, inner)
    o_stk = o_stk * inv_l
    # Sum over head row-blocks: block h is zero outside lane block h, so 3 VPU adds
    # assemble the (nq, inner) multi-head output (no concat, no per-head GEMMs).
    o = o_stk[:nq]
    for h in range(1, heads):
        o = o + o_stk[h * nq:(h + 1) * nq]
    o = o.astype(jnp.bfloat16)                                           # (nq, inner)

    # ---- one output-projection GEMM into the lane-dense padded slab -------------
    o_ref[...] = jnp.dot(o, wo_ref[...],
                         preferred_element_type=jnp.float32).astype(o_ref.dtype)


def _default_batch_block(batch):
    """v7x has two TensorCores per chip: keep 2 parallel grid steps so both stay
    busy.  Single-TensorCore chips (v5e/v6e) fold the whole batch into one grid step
    to avoid ~0.35us per-step pipeline overhead on a microsecond-scale kernel."""
    kind = ""
    try:
        kind = jax.devices()[0].device_kind.lower()
    except Exception:
        pass
    if "v7" in kind and batch >= 2 and batch % 2 == 0:
        return batch // 2
    return batch


def inter_attention(d1, d2, gamma, beta, wq_t, wkv_t, wo_t,
                    *, heads, dim_head, batch_block=None):
    B, N, D = d1.shape
    _, M, _ = d2.shape
    inner = heads * dim_head
    scale = dim_head ** -0.5
    # Lane-dense padded output width (unmasked vst); sliced back to D outside.
    Dp = max(128, ((D + 127) // 128) * 128)

    bb = _default_batch_block(B) if batch_block is None else batch_block
    assert B % bb == 0
    nq, nk = bb * N, bb * M

    # One-time prep outside the kernel (plain XLA): scale folded into Wq, K|V fused
    # into one (D, 2*inner) operand, Wo zero-padded to Dp lanes, all bf16 storage.
    wq = (wq_t * scale).astype(jnp.bfloat16)                             # (D, inner)
    wkv = wkv_t[:, :2 * inner].astype(jnp.bfloat16)                      # (D, 2*inner) = [Wk | Wv]
    wo = jnp.pad(wo_t, ((0, 0), (0, Dp - D))).astype(jnp.bfloat16)       # (inner, Dp), zero-padded

    # Precomputed masks (keeps integer div/mod out of the kernel):
    #  * head-lane mask for the head-tiled K/V: row-block h keeps only lane block h.
    row_head_kv = (jnp.arange(heads * nk) // nk)[:, None]
    lane_head = (jnp.arange(inner) // dim_head)[None, :]
    hl_mask = (row_head_kv == lane_head).astype(jnp.float32)             # (heads*nk, inner)
    #  * additive score bias: 0 on same-(head, batch-row) blocks, -1e30 elsewhere.
    rr = jnp.arange(heads * nq)
    cc = jnp.arange(heads * nk)
    same_head = (rr[:, None] // nq) == (cc[None, :] // nk)
    same_batch = ((rr[:, None] % nq) // N) == ((cc[None, :] % nk) // M)
    score_bias = jnp.where(same_head & same_batch, 0.0, -1e30).astype(jnp.float32)

    d1f = d1.reshape(B * N, D)
    d2f = d2.reshape(B * M, D)

    kernel = functools.partial(_inter_attention_kernel, bb=bb, n_tok=N, m_tok=M,
                               heads=heads, dim_head=dim_head, eps=1e-5)

    out = pl.pallas_call(
        kernel,
        out_shape=jax.ShapeDtypeStruct((B * N, Dp), jnp.float32),
        grid=(B // bb,),
        in_specs=[
            pl.BlockSpec((nq, D), lambda i: (i, 0)),                 # drug1 tokens (queries)
            pl.BlockSpec((nk, D), lambda i: (i, 0)),                 # drug2 tokens (keys/values)
            pl.BlockSpec((1, D), lambda i: (0, 0)),                  # LayerNorm gamma (resident)
            pl.BlockSpec((1, D), lambda i: (0, 0)),                  # LayerNorm beta  (resident)
            pl.BlockSpec((D, inner), lambda i: (0, 0)),              # Wq (scale folded, resident)
            pl.BlockSpec((D, 2 * inner), lambda i: (0, 0)),          # Wk|Wv fused      (resident)
            pl.BlockSpec((inner, Dp), lambda i: (0, 0)),             # Wo (zero-padded, resident)
            pl.BlockSpec((heads * nk, inner), lambda i: (0, 0)),     # head-lane mask   (resident)
            pl.BlockSpec((heads * nq, heads * nk), lambda i: (0, 0)),  # score bias     (resident)
        ],
        out_specs=pl.BlockSpec((nq, Dp), lambda i: (i, 0)),
        compiler_params=pltpu.CompilerParams(
            dimension_semantics=("parallel",)),
        # TODO(synk): at realistic sizes (D multiple of 128, N/M in the hundreds) switch
        # to a flash-style online softmax over M tiles, single-buffer the resident
        # weight blocks (pipeline_mode=pl.Buffered(1)), emit a bf16 output slab, and set
        # vmem_limit_bytes per generation (v7x has half of v6e's VMEM).
    )(d1f, d2f, gamma, beta, wq, wkv, wo, hl_mask, score_bias)

    return out[:, :D].reshape(B, N, D)


def reference(d1, d2, gamma, beta, wq_t, wkv_t, wo_t, *, heads, dim_head):
    """Pure-JAX f32 reference mirroring the (intended) PyTorch forward."""
    inner = heads * dim_head

    def ln(x):
        mu = jnp.mean(x, axis=-1, keepdims=True)
        var = jnp.mean((x - mu) ** 2, axis=-1, keepdims=True)
        return (x - mu) * lax.rsqrt(var + 1e-5) * gamma + beta

    d1n, d2n = ln(d1), ln(d2)
    q = d1n @ wq_t
    k = d2n @ wkv_t[:, :inner]
    v = d2n @ wkv_t[:, inner:2 * inner]
    B, N, _ = q.shape
    M = k.shape[1]
    q = q.reshape(B, N, heads, dim_head).transpose(0, 2, 1, 3)
    k = k.reshape(B, M, heads, dim_head).transpose(0, 2, 1, 3)
    v = v.reshape(B, M, heads, dim_head).transpose(0, 2, 1, 3)
    dots = jnp.einsum('bhnd,bhmd->bhnm', q, k) * (dim_head ** -0.5)
    attn = jax.nn.softmax(dots, axis=-1)
    out = jnp.einsum('bhnm,bhmd->bhnd', attn, v)
    out = out.transpose(0, 2, 1, 3).reshape(B, N, heads * dim_head)
    return out @ wo_t


if __name__ == "__main__":
    # Small shapes consistent with the module's forward.
    B, N, M = 2, 8, 8
    dim, heads, dim_head = 32, 4, 8
    inner = heads * dim_head

    key = jax.random.PRNGKey(0)
    k_d1, k_d2, k_wq, k_wkv, k_wo = jax.random.split(key, 5)

    d1 = jax.random.normal(k_d1, (B, N, dim), dtype=jnp.float32)   # drug1.x
    d2 = jax.random.normal(k_d2, (B, M, dim), dtype=jnp.float32)   # drug2.x

    # Deterministic parameter init (shapes from __init__); stored pre-transposed so the
    # math is x @ W^T as plain x @ W_t.
    gamma = jnp.ones((1, dim), jnp.float32)     # LayerNorm weight (shared norm, as in module)
    beta = jnp.zeros((1, dim), jnp.float32)     # LayerNorm bias
    wq_t = jax.random.normal(k_wq, (dim, inner), dtype=jnp.float32) * 0.05
    wkv_t = jax.random.normal(k_wkv, (dim, 3 * inner), dtype=jnp.float32) * 0.05
    wo_t = jax.random.normal(k_wo, (inner, dim), dtype=jnp.float32) * 0.05

    out = inter_attention(d1, d2, gamma, beta, wq_t, wkv_t, wo_t,
                          heads=heads, dim_head=dim_head)
    out = jax.block_until_ready(out)

    ref = reference(d1, d2, gamma, beta, wq_t, wkv_t, wo_t,
                    heads=heads, dim_head=dim_head)
    assert out.shape == (B, N, dim)
    # bf16 MXU operands + approx reciprocal vs a full-f32 reference: loose tolerance.
    assert jnp.allclose(out, ref, atol=2e-2, rtol=2e-2), float(jnp.max(jnp.abs(out - ref)))

    print("KERNEL_OK")
</pallas_src>

<mosaic_0001>
module attributes {stable_mosaic.version = 11 : i64} {
  func.func @_inter_attention_kernel(%arg0: i32, %arg1: memref<16x32xf32, #tpu.memory_space<vmem>>, %arg2: memref<16x32xf32, #tpu.memory_space<vmem>>, %arg3: memref<1x32xf32, #tpu.memory_space<vmem>>, %arg4: memref<1x32xf32, #tpu.memory_space<vmem>>, %arg5: memref<32x32xbf16, #tpu.memory_space<vmem>>, %arg6: memref<32x64xbf16, #tpu.memory_space<vmem>>, %arg7: memref<32x128xbf16, #tpu.memory_space<vmem>>, %arg8: memref<64x32xf32, #tpu.memory_space<vmem>>, %arg9: memref<64x64xf32, #tpu.memory_space<vmem>>, %arg10: memref<16x128xf32, #tpu.memory_space<vmem>>) attributes {dimension_semantics = [#tpu.dimension_semantics<parallel>], iteration_bounds = array<i64: 1>, scalar_prefetch = 0 : i64, scratch_operands = 0 : i64, tpu.core_type = #tpu.core_type<tc>, window_params = [{transform_indices = @transform_0, window_bounds = array<i64: 16, 32>}, {transform_indices = @transform_1, window_bounds = array<i64: 16, 32>}, {pipeline_mode = #tpu.pipeline_mode<synchronous>, transform_indices = @transform_2, window_bounds = array<i64: 1, 32>}, {pipeline_mode = #tpu.pipeline_mode<synchronous>, transform_indices = @transform_3, window_bounds = array<i64: 1, 32>}, {pipeline_mode = #tpu.pipeline_mode<synchronous>, transform_indices = @transform_4, window_bounds = array<i64: 32, 32>}, {pipeline_mode = #tpu.pipeline_mode<synchronous>, transform_indices = @transform_5, window_bounds = array<i64: 32, 64>}, {pipeline_mode = #tpu.pipeline_mode<synchronous>, transform_indices = @transform_6, window_bounds = array<i64: 32, 128>}, {pipeline_mode = #tpu.pipeline_mode<synchronous>, transform_indices = @transform_7, window_bounds = array<i64: 64, 32>}, {pipeline_mode = #tpu.pipeline_mode<synchronous>, transform_indices = @transform_8, window_bounds = array<i64: 64, 64>}, {transform_indices = @transform_9, window_bounds = array<i64: 16, 128>}]} {
    %c0 = arith.constant 0 : index
    %c0_0 = arith.constant 0 : index
    %0 = vector.load %arg1[%c0, %c0_0] : memref<16x32xf32, #tpu.memory_space<vmem>>, vector<16x32xf32>
    %c0_1 = arith.constant 0 : index
    %c0_2 = arith.constant 0 : index
    %1 = vector.load %arg2[%c0_1, %c0_2] : memref<16x32xf32, #tpu.memory_space<vmem>>, vector<16x32xf32>
    %c0_3 = arith.constant 0 : index
    %c0_4 = arith.constant 0 : index
    %2 = vector.load %arg3[%c0_3, %c0_4] : memref<1x32xf32, #tpu.memory_space<vmem>>, vector<1x32xf32>
    %c0_5 = arith.constant 0 : index
    %c0_6 = arith.constant 0 : index
    %3 = vector.load %arg4[%c0_5, %c0_6] : memref<1x32xf32, #tpu.memory_space<vmem>>, vector<1x32xf32>
    %4 = tpu.concatenate %0, %1 in 0 : vector<16x32xf32>, vector<16x32xf32> -> vector<32x32xf32>
    %cst = arith.constant dense<0.000000e+00> : vector<32xf32>
    %5 = vector.multi_reduction <add>, %4, %cst [1] : vector<32x32xf32> to vector<32xf32>
    %6 = vector.shape_cast %5 : vector<32xf32> to vector<32x1xf32>
    %cst_7 = arith.constant 3.200000e+01 : f32
    %7 = vector.broadcast %cst_7 : f32 to vector<32x1xf32>
    %8 = arith.divf %6, %7 : vector<32x1xf32>
    %9 = vector.broadcast %8 : vector<32x1xf32> to vector<32x32xf32>
    %10 = arith.subf %4, %9 : vector<32x32xf32>
    %11 = arith.mulf %10, %10 : vector<32x32xf32>
    %cst_8 = arith.constant dense<0.000000e+00> : vector<32xf32>
    %12 = vector.multi_reduction <add>, %11, %cst_8 [1] : vector<32x32xf32> to vector<32xf32>
    %13 = vector.shape_cast %12 : vector<32xf32> to vector<32x1xf32>
    %cst_9 = arith.constant 3.200000e+01 : f32
    %14 = vector.broadcast %cst_9 : f32 to vector<32x1xf32>
    %15 = arith.divf %13, %14 : vector<32x1xf32>
    %cst_10 = arith.constant 9.99999974E-6 : f32
    %16 = vector.broadcast %cst_10 : f32 to vector<32x1xf32>
    %17 = arith.addf %15, %16 : vector<32x1xf32>
    %18 = math.rsqrt %17 : vector<32x1xf32>
    %19 = vector.broadcast %18 : vector<32x1xf32> to vector<32x32xf32>
    %20 = arith.mulf %10, %19 : vector<32x32xf32>
    %21 = vector.broadcast %2 : vector<1x32xf32> to vector<32x32xf32>
    %22 = arith.mulf %20, %21 : vector<32x32xf32>
    %23 = vector.broadcast %3 : vector<1x32xf32> to vector<32x32xf32>
    %24 = arith.addf %22, %23 : vector<32x32xf32>
    %25 = vector.extract_strided_slice %24 {offsets = [0, 0], sizes = [16, 32], strides = [1, 1]} : vector<32x32xf32> to vector<16x32xf32>
    %26 = arith.truncf %25 : vector<16x32xf32> to vector<16x32xbf16>
    %27 = vector.extract_strided_slice %24 {offsets = [16, 0], sizes = [16, 32], strides = [1, 1]} : vector<32x32xf32> to vector<16x32xf32>
    %28 = arith.truncf %27 : vector<16x32xf32> to vector<16x32xbf16>
    %c0_11 = arith.constant 0 : index
    %c0_12 = arith.constant 0 : index
    %29 = vector.load %arg5[%c0_11, %c0_12] : memref<32x32xbf16, #tpu.memory_space<vmem>>, vector<32x32xbf16>
    %cst_13 = arith.constant dense<0.000000e+00> : vector<16x32xf32>
    %30 = tpu.matmul %26, %29, %cst_13 {dimension_numbers = #tpu.dot_dimension_numbers<[1], [0], [0], [1], [0, 0, 1, 1], [], []>} : vector<16x32xbf16>, vector<32x32xbf16>, vector<16x32xf32> -> vector<16x32xf32>
    %c0_14 = arith.constant 0 : index
    %c0_15 = arith.constant 0 : index
    %31 = vector.load %arg6[%c0_14, %c0_15] : memref<32x64xbf16, #tpu.memory_space<vmem>>, vector<32x64xbf16>
    %cst_16 = arith.constant dense<0.000000e+00> : vector<16x64xf32>
    %32 = tpu.matmul %28, %31, %cst_16 {dimension_numbers = #tpu.dot_dimension_numbers<[1], [0], [0], [1], [0, 0, 1, 1], [], []>} : vector<16x32xbf16>, vector<32x64xbf16>, vector<16x64xf32> -> vector<16x64xf32>
    %33 = vector.extract_strided_slice %32 {offsets = [0, 0], sizes = [16, 32], strides = [1, 1]} : vector<16x64xf32> to vector<16x32xf32>
    %34 = vector.extract_strided_slice %32 {offsets = [0, 32], sizes = [16, 32], strides = [1, 1]} : vector<16x64xf32> to vector<16x32xf32>
    %c0_17 = arith.constant 0 : index
    %c0_18 = arith.constant 0 : index
    %35 = vector.load %arg8[%c0_17, %c0_18] : memref<64x32xf32, #tpu.memory_space<vmem>>, vector<64x32xf32>
    %36 = tpu.concatenate %30, %30, %30, %30 in 0 : vector<16x32xf32>, vector<16x32xf32>, vector<16x32xf32>, vector<16x32xf32> -> vector<64x32xf32>
    %37 = arith.truncf %36 : vector<64x32xf32> to vector<64x32xbf16>
    %38 = tpu.concatenate %33, %33, %33, %33 in 0 : vector<16x32xf32>, vector<16x32xf32>, vector<16x32xf32>, vector<16x32xf32> -> vector<64x32xf32>
    %39 = arith.mulf %38, %35 : vector<64x32xf32>
    %40 = arith.truncf %39 : vector<64x32xf32> to vector<64x32xbf16>
    %41 = tpu.concatenate %34, %34, %34, %34 in 0 : vector<16x32xf32>, vector<16x32xf32>, vector<16x32xf32>, vector<16x32xf32> -> vector<64x32xf32>
    %42 = arith.mulf %41, %35 : vector<64x32xf32>
    %43 = arith.truncf %42 : vector<64x32xf32> to vector<64x32xbf16>
    %cst_19 = arith.constant dense<0.000000e+00> : vector<64x64xf32>
    %44 = tpu.matmul %37, %40, %cst_19 {dimension_numbers = #tpu.dot_dimension_numbers<[1], [1], [0], [0], [0, 0, 1, 0], [], []>} : vector<64x32xbf16>, vector<64x32xbf16>, vector<64x64xf32> -> vector<64x64xf32>
    %c0_20 = arith.constant 0 : index
    %c0_21 = arith.constant 0 : index
    %45 = vector.load %arg9[%c0_20, %c0_21] : memref<64x64xf32, #tpu.memory_space<vmem>>, vector<64x64xf32>
    %46 = arith.addf %44, %45 : vector<64x64xf32>
    %cst_22 = arith.constant dense<0xFF800000> : vector<64xf32>
    %47 = vector.multi_reduction <maximumf>, %46, %cst_22 [1] : vector<64x64xf32> to vector<64xf32>
    %48 = vector.shape_cast %47 : vector<64xf32> to vector<64x1xf32>
    %49 = vector.broadcast %48 : vector<64x1xf32> to vector<64x64xf32>
    %50 = arith.subf %46, %49 : vector<64x64xf32>
    %51 = math.exp %50 : vector<64x64xf32>
    %cst_23 = arith.constant dense<0.000000e+00> : vector<64xf32>
    %52 = vector.multi_reduction <add>, %51, %cst_23 [1] : vector<64x64xf32> to vector<64xf32>
    %53 = vector.shape_cast %52 : vector<64xf32> to vector<64x1xf32>
    %54 = tpu.reciprocal %53 {approx = true} : vector<64x1xf32> -> vector<64x1xf32>
    %55 = arith.truncf %51 : vector<64x64xf32> to vector<64x64xbf16>
    %cst_24 = arith.constant dense<0.000000e+00> : vector<64x32xf32>
    %56 = tpu.matmul %55, %43, %cst_24 {dimension_numbers = #tpu.dot_dimension_numbers<[1], [0], [0], [1], [0, 0, 1, 1], [], []>} : vector<64x64xbf16>, vector<64x32xbf16>, vector<64x32xf32> -> vector<64x32xf32>
    %57 = vector.broadcast %54 : vector<64x1xf32> to vector<64x32xf32>
    %58 = arith.mulf %56, %57 : vector<64x32xf32>
    %59 = vector.extract_strided_slice %58 {offsets = [0, 0], sizes = [16, 32], strides = [1, 1]} : vector<64x32xf32> to vector<16x32xf32>
    %60 = vector.extract_strided_slice %58 {offsets = [16, 0], sizes = [16, 32], strides = [1, 1]} : vector<64x32xf32> to vector<16x32xf32>
    %61 = arith.addf %59, %60 : vector<16x32xf32>
    %62 = vector.extract_strided_slice %58 {offsets = [32, 0], sizes = [16, 32], strides = [1, 1]} : vector<64x32xf32> to vector<16x32xf32>
    %63 = arith.addf %61, %62 : vector<16x32xf32>
    %64 = vector.extract_strided_slice %58 {offsets = [48, 0], sizes = [16, 32], strides = [1, 1]} : vector<64x32xf32> to vector<16x32xf32>
    %65 = arith.addf %63, %64 : vector<16x32xf32>
    %66 = arith.truncf %65 : vector<16x32xf32> to vector<16x32xbf16>
    %c0_25 = arith.constant 0 : index
    %c0_26 = arith.constant 0 : index
    %67 = vector.load %arg7[%c0_25, %c0_26] : memref<32x128xbf16, #tpu.memory_space<vmem>>, vector<32x128xbf16>
    %cst_27 = arith.constant dense<0.000000e+00> : vector<16x128xf32>
    %68 = tpu.matmul %66, %67, %cst_27 {dimension_numbers = #tpu.dot_dimension_numbers<[1], [0], [0], [1], [0, 0, 1, 1], [], []>} : vector<16x32xbf16>, vector<32x128xbf16>, vector<16x128xf32> -> vector<16x128xf32>
    %c0_28 = arith.constant 0 : index
    %c0_29 = arith.constant 0 : index
    %69 = vector.load %arg10[%c0_28, %c0_29] : memref<16x128xf32, #tpu.memory_space<vmem>>, vector<16x128xf32>
    tpu.vector_store %arg10[%c0_28, %c0_29], %68 {strides = array<i32>} : memref<16x128xf32, #tpu.memory_space<vmem>>, vector<16x128xf32>,
    return
  }
  func.func @transform_0(%arg0: i32) -> (i32, i32) {
    %c0_i32 = arith.constant 0 : i32
    %c0_i32_0 = arith.constant 0 : i32
    return %arg0, %c0_i32 : i32, i32
  }
  func.func @transform_1(%arg0: i32) -> (i32, i32) {
    %c0_i32 = arith.constant 0 : i32
    %c0_i32_0 = arith.constant 0 : i32
    return %arg0, %c0_i32 : i32, i32
  }
  func.func @transform_2(%arg0: i32) -> (i32, i32) {
    %c0_i32 = arith.constant 0 : i32
    %c0_i32_0 = arith.constant 0 : i32
    %c0_i32_1 = arith.constant 0 : i32
    return %c0_i32, %c0_i32_0 : i32, i32
  }
  func.func @transform_3(%arg0: i32) -> (i32, i32) {
    %c0_i32 = arith.constant 0 : i32
    %c0_i32_0 = arith.constant 0 : i32
    %c0_i32_1 = arith.constant 0 : i32
    return %c0_i32, %c0_i32_0 : i32, i32
  }
  func.func @transform_4(%arg0: i32) -> (i32, i32) {
    %c0_i32 = arith.constant 0 : i32
    %c0_i32_0 = arith.constant 0 : i32
    %c0_i32_1 = arith.constant 0 : i32
    return %c0_i32, %c0_i32_0 : i32, i32
  }
  func.func @transform_5(%arg0: i32) -> (i32, i32) {
    %c0_i32 = arith.constant 0 : i32
    %c0_i32_0 = arith.constant 0 : i32
    %c0_i32_1 = arith.constant 0 : i32
    return %c0_i32, %c0_i32_0 : i32, i32
  }
  func.func @transform_6(%arg0: i32) -> (i32, i32) {
    %c0_i32 = arith.constant 0 : i32
    %c0_i32_0 = arith.constant 0 : i32
    %c0_i32_1 = arith.constant 0 : i32
    return %c0_i32, %c0_i32_0 : i32, i32
  }
  func.func @transform_7(%arg0: i32) -> (i32, i32) {
    %c0_i32 = arith.constant 0 : i32
    %c0_i32_0 = arith.constant 0 : i32
    %c0_i32_1 = arith.constant 0 : i32
    return %c0_i32, %c0_i32_0 : i32, i32
  }
  func.func @transform_8(%arg0: i32) -> (i32, i32) {
    %c0_i32 = arith.constant 0 : i32
    %c0_i32_0 = arith.constant 0 : i32
    %c0_i32_1 = arith.constant 0 : i32
    return %c0_i32, %c0_i32_0 : i32, i32
  }
  func.func @transform_9(%arg0: i32) -> (i32, i32) {
    %c0_i32 = arith.constant 0 : i32
    %c0_i32_0 = arith.constant 0 : i32
    return %arg0, %c0_i32 : i32, i32
  }
}

</mosaic_0001>

<bundles_post_ra>
// kernel: tpu_custom_call.1
= control target key start
LH: loop header
LB: loop body
LE: loop exit
PB: predicated region body
PF: predicated region fallthrough
CT: control target
= control target key end

     0   :  { %14 = vsyncpa [#allocation3], 0  ;;  %s1233_s0 = inlined_call_operand.vmem [shape: f32[16,32], index: 0, kind: input, shape index: {}]   ;;  %s1234_s1 = inlined_call_operand.vmem [shape: f32[16,32], index: 1, kind: input, shape index: {}]   ;;  %s1235_s2 = inlined_call_operand.vmem [shape: f32[1,32], index: 2, kind: input, shape index: {}]   ;;  %s1236_s3 = inlined_call_operand.vmem [shape: f32[1,32], index: 3, kind: input, shape index: {}]   ;;  %s1237_s4 = inlined_call_operand.hbm [shape: bf16[32,32], index: 4, kind: input, shape index: {}]   ;;  %s1238_s5 = inlined_call_operand.hbm [shape: bf16[32,64], index: 5, kind: input, shape index: {}]   ;;  %s1239_s6 = inlined_call_operand.hbm [shape: bf16[32,128], index: 6, kind: input, shape index: {}]   ;;  %s1240_s7 = inlined_call_operand.vmem [shape: f32[64,32], index: 7, kind: input, shape index: {}]   ;;  %s1241_s8 = inlined_call_operand.vmem [shape: f32[64,64], index: 8, kind: input, shape index: {}]   ;;  %s1242_s9 = inlined_call_operand.hbm [shape: f32[16,128], index: 9, kind: output, shape index: {}]  }
   0x1   :  { %15 = vsyncpa [#allocation6], 0 }
   0x2   :  { %16 = vsyncpa [#allocation4], 0  ;;  %s951_s30 = smov [#allocation5]   ;;  %s952_s11 = smov [#allocation2]  }
   0x3   :  { %s42_s10 = sshll.u32 %s951_s30, 4  ;;  %s30_s12 = sshll.u32 %s952_s11, 4  ;;  %s43_s10 = int_to_ptr.vmem [resolvable:$true] %s42_s10  ;;  %s31_s12 = int_to_ptr.vmem [resolvable:$true] %s30_s12 }
   0x4   :  { %s873_s13 = scalar_lea.vmem %s43_s10, 256  ;;  %p878_p1 = scmp.lt.s32.totalorder %s43_s10, %s43_s10 }
   0x5   :  { %p874_p0 = scmp.ne.s32.totalorder %s43_s10, %s873_s13  ;;  %p879_p2 = scmp.lt.s32.totalorder %s873_s13, %s873_s13 }
   0x7   :  { %p880_p3 = por %p879_p2, %p878_p1 }
   0x9   :  { %p881_p4 = pnand %p880_p3, %p874_p0 }
   0xb   :  { %884 = shalt.err (!%p881_p4)
}
   0xc   :  { %s953_s14 = smov 64   ;;  %s954_s15 = smov 4  }
   0xd   :  { %48 = dma.hbm_to_vmem [thread:$0]  %s1238_s5, 256, %s43_s10, [#allocation6], %s953_s14, %s953_s14, %s954_s15  }
   0xe   :  { %s893_s18 = scalar_lea.vmem %s31_s12, 256  ;;  %p898_p6 = scmp.lt.s32.totalorder %s31_s12, %s31_s12 }
   0xf   :  { %p894_p5 = scmp.ne.s32.totalorder %s31_s12, %s893_s18  ;;  %p899_p7 = scmp.lt.s32.totalorder %s893_s18, %s893_s18 }
  0x11   :  { %p900_p8 = por %p899_p7, %p898_p6 }
  0x13   :  { %p901_p9 = pnand %p900_p8, %p894_p5 }
  0x15   :  { %904 = shalt.err (!%p901_p9)
}
  0x16   :  { %36 = dma.hbm_to_vmem [thread:$0]  %s1237_s4, 256, %s31_s12, [#allocation3], %s953_s14, %s953_s14, %s954_s15  }
  0x17   :  { %s955_s21 = smov [#allocation7]  }
  0x18   :  { %s54_s22 = sshll.u32 %s955_s21, 4  ;;  %s55_s22 = int_to_ptr.vmem [resolvable:$true] %s54_s22 }
  0x19   :  { %s913_s23 = scalar_lea.vmem %s55_s22, 256  ;;  %p918_p11 = scmp.lt.s32.totalorder %s55_s22, %s55_s22 }
  0x1a   :  { %p914_p10 = scmp.ne.s32.totalorder %s55_s22, %s913_s23  ;;  %p919_p12 = scmp.lt.s32.totalorder %s913_s23, %s913_s23 }
  0x1c   :  { %p920_p13 = por %p919_p12, %p918_p11 }
  0x1e   :  { %p921_p0 = pnand %p920_p13, %p914_p10 }
  0x20   :  { %924 = shalt.err (!%p921_p0)
}
  0x21   :  { %60 = dma.hbm_to_vmem [thread:$0]  %s1239_s6, 256, %s55_s22, [#allocation6], %s953_s14, %s953_s14, %s954_s15  }
  0x22   :  { %945 = dma.done.wait [#allocation3], 256  }
  0x23   :  { %946 = vsyncadd [#allocation3], 4294967040 }
  0x24   :  { %947 = dma.done.wait [#allocation6], 512  }
  0x25   :  { %948 = vsyncadd [#allocation6], 4294966784  ;;  %vm81_vm0 = vcmask 261120   ;;  %v77_v0 = vld [vmem:[%s1234_s1] sm:$0xff]  ;;  %v78_v1 = vld [vmem:[%s1234_s1 + $0x8] sm:$0xff]  ;;  %v956_v30 = vmov 0.0  }
  0x26   :  { %v75_v2 = vld [vmem:[%s1233_s0] sm:$0xff]  ;;  %v88_v3 = vsel %vm81_vm0, %v77_v0, 0.0  ;;  %v76_v5 = vld [vmem:[%s1233_s0 + $0x8] sm:$0xff]  ;;  %v91_v6 = vsel %vm81_vm0, %v78_v1, 0.0  ;;  %v819_v28 = vld [vmem:[#allocation5 + $0x8] sm:$0xff]   ;;  %755 = vmatprep.subr.bf16.mxu1 %v956_v30  ;;  %747 = vmatprep.subr.bf16.mxu0 %v956_v30  ;;  %vm957_vm1 = vmmov 0  }
  0x27   :  { %v82_v4 = vsel %vm81_vm0, %v75_v2, 0.0  ;;  %89 = vadd.xlane.f32.xlu0 %v88_v3  ;;  %v85_v7 = vsel %vm81_vm0, %v76_v5, 0.0  ;;  %v820_v29 = vld [vmem:[#allocation2 + $0x8] sm:$0xff]   ;;  %756 = vmatpush3.bf16.msra.mxu1 %v819_v28  ;;  %v821_v31 = vld [vmem:[#allocation5] sm:$0xff]   ;;  %v822_v32 = vld [vmem:[#allocation2] sm:$0xff]   ;;  %s958_s12 = smov 32  }
  0x28   :  { %83 = vadd.xlane.f32.xlu1 %v82_v4  ;;  %748 = vmatpush3.bf16.msra.mxu0 %v820_v29  ;;  %v1069_v33 = vld [vmem:[%s1240_s7 + $0x38] sm:$0xff]  ;;  %v1074_v34 = vld [vmem:[%s1240_s7 + $0x30] sm:$0xff]  ;;  %v1081_v35 = vld [vmem:[%s1240_s7 + $0x20] sm:$0xff]  ;;  %vm430_vm2 = vcmask 523264  }
  0x29   :  { %757 = vmatprep.subr.bf16.mxu1 %v956_v30  ;;  %759 = vmatprep.mubr.msk.bf16.mxu1 %vm957_vm1, %v956_v30  ;;  %v1086_v36 = vld [vmem:[%s1240_s7 + $0x10] sm:$0xff]  ;;  %v1093_v37 = vld [vmem:[%s1240_s7 + $0x28] sm:$0xff]  ;;  %v1098_v38 = vld [vmem:[%s1240_s7] sm:$0xff] }
  0x2a   :  { %749 = vmatprep.subr.bf16.mxu0 %v956_v30  ;;  %751 = vmatprep.mubr.msk.bf16.mxu0 %vm957_vm1, %v956_v30  ;;  %v1105_v39 = vld [vmem:[%s1240_s7 + $0x18] sm:$0xff]  ;;  %v1111_v40 = vld [vmem:[%s1240_s7 + $0x8] sm:$0xff]  ;;  %v703_v55 = vld [vmem:[%s1235_s2] ss:$0 sm:$0xff] }
  0x2b   :  { %92 = vadd.xlane.f32.xlu0 %v91_v6  ;;  %758 = vmatpush3.bf16.msra.mxu1 %v821_v31  ;;  %v704_v61 = vld [vmem:[%s1236_s3] ss:$0 sm:$0xff] }
  0x2c   :  { %86 = vadd.xlane.f32.xlu1 %v85_v7  ;;  %750 = vmatpush3.bf16.msra.mxu0 %v822_v32 }
  0xb0   :  { %v90_v8 = vpop.xlane.xlu0 %89 }
  0xb1   :  { %v84_v9 = vpop.xlane.xlu1 %83  ;;  %v97_v10 = vmul.f32 0.03125, %v90_v8 }
  0xb2   :  { %v95_v11 = vmul.f32 0.03125, %v84_v9 }
  0xb3   :  { %v1038_v12 = vsub.f32 %v77_v0, %v97_v10 }
  0xb4   :  { %v1040_v13 = vsub.f32 %v75_v2, %v95_v11  ;;  %v93_v14 = vpop.xlane.xlu0 %92 }
  0xb5   :  { %v87_v15 = vpop.xlane.xlu1 %86  ;;  %v98_v16 = vmul.f32 0.03125, %v93_v14  ;;  %v105_v17 = vmul.f32 %v1038_v12, %v1038_v12 }
  0xb6   :  { %v96_v18 = vmul.f32 0.03125, %v87_v15  ;;  %v103_v19 = vmul.f32 %v1040_v13, %v1040_v13 }
  0xb7   :  { %v1046_v20 = vsub.f32 %v78_v1, %v98_v16  ;;  %v113_v21 = vsel %vm81_vm0, %v105_v17, 0.0 }
  0xb8   :  { %v1049_v22 = vsub.f32 %v76_v5, %v96_v18  ;;  %114 = vadd.xlane.f32.xlu0 %v113_v21  ;;  %v107_v24 = vsel %vm81_vm0, %v103_v19, 0.0 }
  0xb9   :  { %v106_v23 = vmul.f32 %v1046_v20, %v1046_v20 }
  0xba   :  { %v104_v25 = vmul.f32 %v1049_v22, %v1049_v22 }
  0xbb   :  { %v116_v26 = vsel %vm81_vm0, %v106_v23, 0.0 }
  0xbc   :  { %117 = vadd.xlane.f32.xlu1 %v116_v26  ;;  %108 = vadd.xlane.f32.xlu0 %v107_v24  ;;  %v110_v27 = vsel %vm81_vm0, %v104_v25, 0.0 }
  0xc0   :  { %111 = vadd.xlane.f32.xlu1 %v110_v27 }
  0xd1   :  { %320 = vrot.lane.b32.xlu1 %v1069_v33, %s958_s12 }
  0xd2   :  { %318 = vrot.lane.b32.xlu0 %v1074_v34, %s958_s12 }
  0xd5   :  { %314 = vrot.lane.b32.xlu1 %v1081_v35, %s958_s12 }
  0xd6   :  { %310 = vrot.lane.b32.xlu0 %v1086_v36, %s958_s12 }
  0xd9   :  { %316 = vrot.lane.b32.xlu1 %v1093_v37, %s958_s12 }
  0xda   :  { %306 = vrot.lane.b32.xlu0 %v1098_v38, %s958_s12 }
  0xdd   :  { %312 = vrot.lane.b32.xlu1 %v1105_v39, %s958_s12 }
  0xe1   :  { %308 = vrot.lane.b32.xlu1 %v1111_v40, %s958_s12  ;;  %s959_s12 = smov 96  }
 0x141   :  { %v115_v41 = vpop.xlane.xlu0 %114 }
 0x142   :  { %v121_v42 = vmul.f32 0.03125, %v115_v41 }
 0x144   :  { %v125_v43 = vadd.f32 1e-05, %v121_v42 }
 0x145   :  { %v109_v44 = vpop.xlane.xlu0 %108  ;;  %v118_v45 = vpop.xlane.xlu1 %117 }
 0x146   :  { %825 = vrsqrt.f32 %v125_v43  ;;  %v119_v46 = vmul.f32 0.03125, %v109_v44  ;;  %v122_v47 = vmul.f32 0.03125, %v118_v45 }
 0x148   :  { %v123_v48 = vadd.f32 1e-05, %v119_v46  ;;  %v126_v49 = vadd.f32 1e-05, %v122_v47 }
 0x149   :  { %v112_v50 = vpop.xlane.xlu1 %111  ;;  %v319_v11 = vpop.permute.xlu0 %318 }
 0x14a   :  { %827 = vrsqrt.f32 %v123_v48  ;;  %v120_v51 = vmul.f32 0.03125, %v112_v50 }
 0x14b   :  { %829 = vrsqrt.f32 %v126_v49 }
 0x14c   :  { %v124_v52 = vadd.f32 1e-05, %v120_v51 }
 0x14d   :  { %v321_v9 = vpop.permute.xlu1 %320 }
 0x14e   :  { %831 = vrsqrt.f32 %v124_v52 }
 0x151   :  { %v315_v10 = vpop.permute.xlu1 %314 }
 0x153   :  { %v826_v53 = vpop.eup %825 }
 0x154   :  { %v133_v54 = vmul.f32 %v826_v53, %v1038_v12 }
 0x155   :  { %v317_v12 = vpop.permute.xlu1 %316 }
 0x156   :  { %v143_v60 = vmul.f32 %v703_v55, %v133_v54 }
 0x157   :  { %v828_v56 = vpop.eup %827 }
 0x158   :  { %v830_v57 = vpop.eup %829  ;;  %v131_v58 = vmul.f32 %v828_v56, %v1040_v13  ;;  %v153_v2 = vadd.f32 %v704_v61, %v143_v60  ;;  %v311_v13 = vpop.permute.xlu0 %310 }
 0x159   :  { %v134_v59 = vmul.f32 %v830_v57, %v1046_v20  ;;  %v313_v14 = vpop.permute.xlu1 %312 }
 0x15a   :  { %v141_v1 = vmul.f32 %v703_v55, %v131_v58 }
 0x15b   :  { %v832_v62 = vpop.eup %831  ;;  %v144_v63 = vmul.f32 %v703_v55, %v134_v59 }
 0x15c   :  { %v132_v0 = vmul.f32 %v832_v62, %v1049_v22  ;;  %v151_v6 = vadd.f32 %v704_v61, %v141_v1  ;;  %v307_v16 = vpop.permute.xlu0 %306  ;;  %v345_v62 = vld [vmem:[%s1241_s8 + $0x18] sm:$0xff] }
 0x15d   :  { %v154_v3 = vadd.f32 %v704_v61, %v144_v63  ;;  %v309_v18 = vpop.permute.xlu1 %308 }
 0x15e   :  { %v142_v4 = vmul.f32 %v703_v55, %v132_v0  ;;  %v343_v0 = vld [vmem:[%s1241_s8 + $0x8] sm:$0xff] }
 0x15f   :  { %v156_v5 = vpack.c.bf16 %v154_v3, %v153_v2 }
 0x160   :  { %v152_v7 = vadd.f32 %v704_v61, %v142_v4 }
 0x161   :  { %760 = vmatmul.mubr.msk.bf16.vlgmr.msra.gmra.mxu1 %vm81_vm0, %v156_v5  ;;  %v348_v5 = vld [vmem:[%s1241_s8 + $0x30] sm:$0xff] }
 0x162   :  { %v155_v8 = vpack.c.bf16 %v152_v7, %v151_v6 }
 0x164   :  { %752 = vmatmul.mubr.msk.bf16.vlgmr.msra.gmra.mxu0 %vm81_vm0, %v155_v8 }
 0x221   :  { %v270_v15 = vpop.f32.mrf.mxu1 }
 0x222   :  { %v1126_v21 = vmul.f32 %v307_v16, %v270_v15  ;;  %v292_v22 = vmul.f32 %v1074_v34, %v270_v15  ;;  %v1133_v27 = vmul.f32 %v315_v10, %v270_v15  ;;  %v1137_v31 = vmul.f32 %v311_v13, %v270_v15 }
 0x223   :  { %v761_v17 = vpop.f32.mrf.mxu1  ;;  %v1146_v44 = vmul.f32 %v319_v11, %v270_v15  ;;  %v288_v51 = vmul.f32 %v1086_v36, %v270_v15  ;;  %v286_v55 = vmul.f32 %v1098_v38, %v270_v15  ;;  %v344_v36 = vld [vmem:[%s1241_s8 + $0x10] sm:$0xff]  ;;  %v346_v11 = vld [vmem:[%s1241_s8 + $0x20] sm:$0xff] }
 0x224   :  { %v210_v19 = vpop.f32.mrf.mxu0 }
 0x225   :  { %v273_v20 = vpop.f32.mrf.mxu1 }
 0x226   :  { %v1129_v23 = vmul.f32 %v309_v18, %v273_v20  ;;  %v753_v24 = vpop.f32.mrf.mxu0  ;;  %v293_v25 = vmul.f32 %v1069_v33, %v273_v20  ;;  %v291_v26 = vmul.f32 %v1093_v37, %v273_v20  ;;  %v1135_v29 = vmul.f32 %v317_v12, %v273_v20 }
 0x227   :  { %v762_v28 = vpop.f32.mrf.mxu1  ;;  %v1139_v32 = vmul.f32 %v313_v14, %v273_v20  ;;  %v1141_v41 = vmul.f32 %v321_v9, %v273_v20  ;;  %v290_v33 = vmul.f32 %v1081_v35, %v270_v15  ;;  %v289_v35 = vmul.f32 %v1105_v39, %v273_v20  ;;  %v349_v15 = vld [vmem:[%s1241_s8 + $0x38] sm:$0xff] }
 0x228   :  { %v338_v34 = vpack.c.bf16 %v1129_v23, %v1126_v21  ;;  %v213_v42 = vpop.f32.mrf.mxu0  ;;  %v297_v43 = vpack.c.bf16 %v293_v25, %v292_v22  ;;  %v340_v45 = vpack.c.bf16 %v1135_v29, %v1133_v27  ;;  %v287_v54 = vmul.f32 %v1111_v40, %v273_v20  ;;  %v342_v40 = vld [vmem:[%s1241_s8] sm:$0xff] }
 0x229   :  { %v285_v37 = vpack.c.bf16 %v213_v42, %v210_v19  ;;  %v339_v46 = vpack.c.bf16 %v1139_v32, %v1137_v31  ;;  %v296_v49 = vpack.c.bf16 %v291_v26, %v290_v33  ;;  %v341_v50 = vpack.c.bf16 %v1141_v41, %v1146_v44  ;;  %v347_v19 = vld [vmem:[%s1241_s8 + $0x28] sm:$0xff]  ;;  %s960_s8 = smov [#allocation8]  }
 0x22a   :  { %803 = vmatprep.subr.msk.bf16.mxu0 %vm81_vm0, %v297_v43  ;;  %v754_v47 = vpop.f32.mrf.mxu0  ;;  %v363_v48 = vsel %vm81_vm0, %v297_v43, 0  ;;  %v295_v53 = vpack.c.bf16 %v289_v35, %v288_v51  ;;  %v294_v57 = vpack.c.bf16 %v287_v54, %v286_v55  ;;  %s690_s17 = sshll.u32 %s960_s8, 4  ;;  %s691_s17 = int_to_ptr.vmem [resolvable:$true] %s690_s17 }
 0x22b   :  { %764 = vmatpush3.bf16.xpose.msra.mxu0 %v363_v48  ;;  %771 = vmatprep.mubr.msk.bf16.mxu0 %vm81_vm0, %v285_v37  ;;  %v360_v52 = vsel %vm81_vm0, %v296_v49, 0  ;;  %s925_s18 = scalar_lea.vmem %s691_s17, 256  ;;  %p930_p2 = scmp.lt.s32.totalorder %s691_s17, %s691_s17 }
 0x22c   :  { %804 = vmatprep.subr.msk.bf16.mxu0 %vm81_vm0, %v296_v49  ;;  %v357_v56 = vsel %vm81_vm0, %v295_v53, 0  ;;  %v354_v39 = vsel %vm81_vm0, %v294_v57, 0  ;;  %p926_p1 = scmp.ne.s32.totalorder %s691_s17, %s925_s18  ;;  %p931_p3 = scmp.lt.s32.totalorder %s925_s18, %s925_s18 }
 0x22e   :  { %p932_p4 = por %p931_p3, %p930_p2 }
 0x230   :  { %p933_p5 = pnand %p932_p4, %p926_p1 }
 0x233   :  { %766 = vmatpush3.bf16.xpose.msra.mxu0 %v360_v52 }
 0x234   :  { %805 = vmatprep.subr.msk.bf16.mxu0 %vm81_vm0, %v295_v53 }
 0x23b   :  { %768 = vmatpush3.bf16.xpose.msra.mxu0 %v357_v56 }
 0x23c   :  { %806 = vmatprep.subr.msk.bf16.mxu0 %vm81_vm0, %v294_v57 }
 0x243   :  { %770 = vmatpush3.bf16.xpose.msra.mxu0 %v354_v39 }
 0x24a   :  { %772 = vmatmul.mubr.msk.bf16.vlgmr.msra.gmra.mxu0 %vm81_vm0, %v285_v37 }
 0x24b   :  { %775 = vmatprep.mubr.msk.bf16.mxu0 %vm81_vm0, %v285_v37 }
 0x252   :  { %776 = vmatmul.mubr.msk.bf16.gmra.mxu0 %vm81_vm0, %v285_v37 }
 0x30a   :  { %v773_v38 = vpop.f32.mrf.mxu0 }
 0x30b   :  { %v408_v58 = vadd.f32 %v773_v38, %v344_v36 }
 0x30c   :  { %v399_v59 = vpop.f32.mrf.mxu0 }
 0x30d   :  { %v400_v60 = vadd.f32 %v399_v59, %v342_v40  ;;  %v437_v61 = vsel %vm430_vm2, %v408_v58, -inf }
 0x30e   :  { %438 = vmax.xlane.f32.xlu0 %v437_v61  ;;  %v774_v63 = vpop.f32.mrf.mxu0 }
 0x30f   :  { %v411_v2 = vadd.f32 %v774_v63, %v345_v62  ;;  %v431_v4 = vsel %vm430_vm2, %v400_v60, -inf }
 0x310   :  { %v402_v1 = vpop.f32.mrf.mxu0 }
 0x311   :  { %v403_v3 = vadd.f32 %v402_v1, %v343_v0  ;;  %v440_v9 = vsel %vm430_vm2, %v411_v2, -inf }
 0x312   :  { %v777_v6 = vpop.f32.mrf.mxu0  ;;  %432 = vmax.xlane.f32.xlu0 %v431_v4 }
 0x313   :  { %v434_v7 = vsel %vm430_vm2, %v403_v3, -inf  ;;  %v424_v8 = vadd.f32 %v777_v6, %v348_v5 }
 0x314   :  { %435 = vmax.xlane.f32.xlu1 %v434_v7  ;;  %v415_v10 = vpop.f32.mrf.mxu0 }
 0x315   :  { %v416_v12 = vadd.f32 %v415_v10, %v346_v11  ;;  %v449_v13 = vsel %vm430_vm2, %v424_v8, -inf }
 0x316   :  { %441 = vmax.xlane.f32.xlu0 %v440_v9  ;;  %v778_v16 = vpop.f32.mrf.mxu0  ;;  %v824_v9 = vld [vmem:[#allocation7] sm:$0xff]  }
 0x317   :  { %v443_v14 = vsel %vm430_vm2, %v416_v12, -inf  ;;  %v1197_v17 = vadd.f32 %v778_v16, %v349_v15 }
 0x318   :  { %v418_v18 = vpop.f32.mrf.mxu0 }
 0x319   :  { %v1202_v20 = vadd.f32 %v418_v18, %v347_v19  ;;  %v452_v22 = vsel %vm430_vm2, %v1197_v17, -inf }
 0x31a   :  { %450 = vmax.xlane.f32.xlu0 %v449_v13 }
 0x31b   :  { %v446_v24 = vsel %vm430_vm2, %v1202_v20, -inf }
 0x31e   :  { %444 = vmax.xlane.f32.xlu0 %v443_v14 }
 0x325   :  { %523 = vrot.lane.b32.xlu1 %v340_v45, %s959_s12 }
 0x329   :  { %521 = vrot.lane.b32.xlu1 %v339_v46, %s959_s12 }
 0x334   :  { %525 = vrot.lane.b32.xlu0 %v341_v50, %s959_s12 }
 0x34d   :  { %453 = vmax.xlane.f32.xlu1 %v452_v22 }
 0x351   :  { %447 = vmax.xlane.f32.xlu1 %v446_v24 }
 0x362   :  { %519 = vrot.lane.b32.xlu1 %v338_v34, %s959_s12 }
 0x397   :  { %v439_v25 = vpop.xlane.xlu0 %438 }
 0x398   :  { %v457_v26 = vsub.f32 %v408_v58, %v439_v25 }
 0x39a   :  { %v467_v27 = vmul.f32 1.442695, %v457_v26 }
 0x39b   :  { %v433_v28 = vpop.xlane.xlu0 %432 }
 0x39c   :  { %833 = vpow2.f32 %v467_v27  ;;  %v455_v29 = vsub.f32 %v400_v60, %v433_v28 }
 0x39d   :  { %v436_v31 = vpop.xlane.xlu1 %435 }
 0x39e   :  { %v463_v32 = vmul.f32 1.442695, %v455_v29  ;;  %v456_v41 = vsub.f32 %v403_v3, %v436_v31 }
 0x39f   :  { %v442_v42 = vpop.xlane.xlu0 %441 }
 0x3a0   :  { %835 = vpow2.f32 %v463_v32  ;;  %v465_v43 = vmul.f32 1.442695, %v456_v41  ;;  %v458_v33 = vsub.f32 %v411_v2, %v442_v42 }
 0x3a1   :  { %v524_v49 = vpop.permute.xlu1 %523 }
 0x3a2   :  { %837 = vpow2.f32 %v465_v43  ;;  %v469_v44 = vmul.f32 1.442695, %v458_v33 }
 0x3a3   :  { %v451_v37 = vpop.xlane.xlu0 %450 }
 0x3a4   :  { %839 = vpow2.f32 %v469_v44  ;;  %v461_v45 = vsub.f32 %v424_v8, %v451_v37  ;;  %v823_v8 = vld [vmem:[#allocation7 + $0x8] sm:$0xff]  }
 0x3a5   :  { %v522_v56 = vpop.permute.xlu1 %521 }
 0x3a6   :  { %v475_v46 = vmul.f32 1.442695, %v461_v45 }
 0x3a7   :  { %v445_v21 = vpop.xlane.xlu0 %444 }
 0x3a8   :  { %v459_v23 = vsub.f32 %v416_v12, %v445_v21 }
 0x3a9   :  { %v834_v34 = vpop.eup %833 }
 0x3aa   :  { %v471_v47 = vmul.f32 1.442695, %v459_v23  ;;  %v485_v48 = vsel %vm430_vm2, %v834_v34, 0.0 }
 0x3ab   :  { %486 = vadd.xlane.f32.xlu0 %v485_v48  ;;  %v526_v50 = vpop.permute.xlu0 %525 }
 0x3ac   :  { %841 = vpow2.f32 %v471_v47  ;;  %779 = vmatprep.subr.bf16.mxu1 %v526_v50 }
 0x3ad   :  { %v836_v35 = vpop.eup %835  ;;  %780 = vmatpush3.bf16.msra.mxu1 %v526_v50  ;;  %843 = vpow2.f32 %v475_v46 }
 0x3ae   :  { %781 = vmatprep.subr.bf16.mxu1 %v524_v49  ;;  %v479_v51 = vsel %vm430_vm2, %v836_v35, 0.0 }
 0x3af   :  { %v838_v52 = vpop.eup %837  ;;  %480 = vadd.xlane.f32.xlu0 %v479_v51 }
 0x3b0   :  { %v482_v53 = vsel %vm430_vm2, %v838_v52, 0.0  ;;  %v511_v54 = vpack.c.bf16 %v838_v52, %v836_v35 }
 0x3b1   :  { %v840_v55 = vpop.eup %839  ;;  %483 = vadd.xlane.f32.xlu1 %v482_v53  ;;  %782 = vmatpush3.bf16.msra.mxu1 %v524_v49 }
 0x3b2   :  { %783 = vmatprep.subr.bf16.mxu1 %v522_v56  ;;  %787 = vmatprep.mubr.msk.bf16.mxu1 %vm430_vm2, %v511_v54  ;;  %v488_v57 = vsel %vm430_vm2, %v840_v55, 0.0  ;;  %v512_v1 = vpack.c.bf16 %v840_v55, %v834_v34 }
 0x3b3   :  { %489 = vadd.xlane.f32.xlu0 %v488_v57 }
 0x3b5   :  { %784 = vmatpush3.bf16.msra.mxu1 %v522_v56 }
 0x3b9   :  { %v842_v39 = vpop.eup %841 }
 0x3ba   :  { %v491_v36 = vsel %vm430_vm2, %v842_v39, 0.0  ;;  %v844_v38 = vpop.eup %843 }
 0x3bb   :  { %492 = vadd.xlane.f32.xlu0 %v491_v36  ;;  %v497_v40 = vsel %vm430_vm2, %v844_v38, 0.0 }
 0x3bf   :  { %498 = vadd.xlane.f32.xlu0 %v497_v40 }
 0x3d6   :  { %v454_v58 = vpop.xlane.xlu1 %453 }
 0x3d7   :  { %v462_v59 = vsub.f32 %v1197_v17, %v454_v58 }
 0x3d9   :  { %v477_v60 = vmul.f32 1.442695, %v462_v59 }
 0x3da   :  { %v448_v61 = vpop.xlane.xlu1 %447 }
 0x3db   :  { %v460_v62 = vsub.f32 %v1202_v20, %v448_v61  ;;  %845 = vpow2.f32 %v477_v60 }
 0x3dd   :  { %v473_v63 = vmul.f32 1.442695, %v460_v62 }
 0x3de   :  { %v520_v0 = vpop.permute.xlu1 %519 }
 0x3df   :  { %847 = vpow2.f32 %v473_v63  ;;  %785 = vmatprep.subr.bf16.mxu1 %v520_v0 }
 0x3e0   :  { %786 = vmatpush3.bf16.msra.mxu1 %v520_v0 }
 0x3e1   :  { %795 = vmatprep.subr.bf16.mxu1 %v956_v30 }
 0x3e3   :  { %788 = vmatmul.mubr.msk.bf16.vlgmr.msra.gmra.mxu1 %vm430_vm2, %v512_v1 }
 0x3e4   :  { %796 = vmatpush3.bf16.msra.mxu1 %v823_v8 }
 0x3e5   :  { %797 = vmatprep.subr.bf16.mxu1 %v956_v30 }
 0x3e8   :  { %v846_v2 = vpop.eup %845  ;;  %798 = vmatpush3.bf16.msra.mxu1 %v824_v9 }
 0x3e9   :  { %v514_v6 = vpack.c.bf16 %v846_v2, %v844_v38  ;;  %v500_v7 = vsel %vm430_vm2, %v846_v2, 0.0 }
 0x3ec   :  { %v848_v3 = vpop.eup %847 }
 0x3ed   :  { %v494_v4 = vsel %vm430_vm2, %v848_v3, 0.0  ;;  %v513_v5 = vpack.c.bf16 %v848_v3, %v842_v39 }
 0x3ee   :  { %495 = vadd.xlane.f32.xlu1 %v494_v4 }
 0x3ef   :  { %791 = vmatprep.mubr.msk.bf16.mxu1 %vm430_vm2, %v513_v5 }
 0x3f0   :  { %792 = vmatmul.mubr.msk.bf16.gmra.mxu1 %vm430_vm2, %v514_v6 }
 0x3f1   :  { %799 = vmatprep.mubr.msk.bf16.mxu1 %vm957_vm1, %v956_v30 }
 0x3f2   :  { %501 = vadd.xlane.f32.xlu1 %v500_v7 }
 0x434   :  { %v487_v10 = vpop.xlane.xlu0 %486 }
 0x435   :  { %849 = vrcp.f32 %v487_v10 }
 0x438   :  { %v481_v11 = vpop.xlane.xlu0 %480 }
 0x439   :  { %851 = vrcp.f32 %v481_v11 }
 0x43a   :  { %v484_v13 = vpop.xlane.xlu1 %483 }
 0x43b   :  { %853 = vrcp.f32 %v484_v13 }
 0x43c   :  { %v490_v12 = vpop.xlane.xlu0 %489 }
 0x442   :  { %v850_v22 = vpop.eup %849 }
 0x444   :  { %v493_v14 = vpop.xlane.xlu0 %492 }
 0x445   :  { %855 = vrcp.f32 %v493_v14 }
 0x446   :  { %857 = vrcp.f32 %v490_v12  ;;  %v852_v24 = vpop.eup %851 }
 0x448   :  { %v499_v18 = vpop.xlane.xlu0 %498  ;;  %v854_v26 = vpop.eup %853 }
 0x452   :  { %v856_v28 = vpop.eup %855 }
 0x453   :  { %v858_v42 = vpop.eup %857 }
 0x477   :  { %v496_v15 = vpop.xlane.xlu1 %495 }
 0x478   :  { %859 = vrcp.f32 %v496_v15 }
 0x479   :  { %861 = vrcp.f32 %v499_v18 }
 0x47b   :  { %v502_v19 = vpop.xlane.xlu1 %501 }
 0x47c   :  { %863 = vrcp.f32 %v502_v19 }
 0x485   :  { %v860_v37 = vpop.eup %859 }
 0x486   :  { %v862_v21 = vpop.eup %861 }
 0x489   :  { %v864_v47 = vpop.eup %863 }
 0x4a3   :  { %v789_v16 = vpop.f32.mrf.mxu1 }
 0x4a4   :  { %v610_v31 = vmul.f32 %v850_v22, %v789_v16 }
 0x4a5   :  { %v577_v17 = vpop.f32.mrf.mxu1 }
 0x4a6   :  { %v608_v27 = vmul.f32 %v852_v24, %v577_v17 }
 0x4a7   :  { %v790_v30 = vpop.f32.mrf.mxu1 }
 0x4a8   :  { %v616_v33 = vadd.f32 %v610_v31, %v608_v27  ;;  %v611_v44 = vmul.f32 %v858_v42, %v790_v30 }
 0x4a9   :  { %v580_v20 = vpop.f32.mrf.mxu1 }
 0x4aa   :  { %v609_v32 = vmul.f32 %v854_v26, %v580_v20 }
 0x4ac   :  { %v617_v23 = vadd.f32 %v611_v44, %v609_v32 }
 0x4b0   :  { %v793_v25 = vpop.f32.mrf.mxu1 }
 0x4b1   :  { %v614_v48 = vmul.f32 %v862_v21, %v793_v25 }
 0x4b2   :  { %v593_v29 = vpop.f32.mrf.mxu1 }
 0x4b3   :  { %v612_v41 = vmul.f32 %v856_v28, %v593_v29 }
 0x4b4   :  { %v794_v43 = vpop.f32.mrf.mxu1 }
 0x4b5   :  { %v618_v34 = vadd.f32 %v616_v33, %v612_v41  ;;  %v615_v49 = vmul.f32 %v864_v47, %v794_v43 }
 0x4b6   :  { %v596_v45 = vpop.f32.mrf.mxu1 }
 0x4b7   :  { %v613_v46 = vmul.f32 %v860_v37, %v596_v45  ;;  %v620_v35 = vadd.f32 %v618_v34, %v614_v48 }
 0x4b9   :  { %v619_v50 = vadd.f32 %v617_v23, %v613_v46 }
 0x4bb   :  { %v621_v51 = vadd.f32 %v619_v50, %v615_v49 }
 0x4bd   :  { %v622_v52 = vpack.c.bf16 %v621_v51, %v620_v35 }
 0x4bf   :  { %800 = vmatmul.mubr.msk.bf16.vlgmr.msra.gmra.mxu1 %vm81_vm0, %v622_v52 }
 0x57f   :  { %v676_v53 = vpop.f32.mrf.mxu1 }
 0x580   :  { %683 = vst [vmem:[#allocation8] sm:$0xff] %v676_v53 }
 0x581   :  { %v801_v54 = vpop.f32.mrf.mxu1 }
 0x583   :  { %v679_v55 = vpop.f32.mrf.mxu1 }
 0x584   :  { %684 = vst [vmem:[#allocation8 + $0x8] sm:$0xff] %v679_v55 }
 0x585   :  { %v802_v56 = vpop.f32.mrf.mxu1 }
 0x586   :  { %936 = shalt.err (!%p933_p5)
}
 0x587   :  { %s961_s19 = smov 128   ;;  %s962_s20 = smov 8  }
 0x588   :  { %696 = dma.vmem_to_hbm [thread:$0]  %s691_s17, 256, %s1242_s9, [#allocation4], %s961_s19, %s961_s19, %s962_s20  }
 0x589   :  { %949 = dma.done.wait [#allocation4], 256  }
 0x58a   :  { %950 = vsyncadd [#allocation4], 4294967040 }
 0x58b   :  { %700 = vsyncpa [#allocation3], 1 }
 0x58c   :  { %701 = vsyncpa [#allocation6], 1 }
 0x58d   :  { %702 = vsyncpa [#allocation4], 1 }

</bundles_post_ra>
